<compile_context>
chip_gen: v6e
topology: v6e:2x2x1
jax: 0.10.0
libtpu: 0.0.40
codegen_flags: <defaults>
</compile_context>

<pallas_src>
import functools

import jax
import jax.numpy as jnp
from jax import lax
from jax.experimental import pallas as pl
from jax.experimental.pallas import tpu as pltpu

_EPS = 1e-5


def _basic_block_kernel(x_ref, w1_ref, b1_ref, w2_ref, b2_ref, mask_ref,
                        o_ref, patch_scr, act_scr, *, img_w):
    # x_ref    : (1, C, H*W)   one image; channels on sublanes, flat spatial on lanes
    # w1_ref   : (P, 9*C)      conv1 weights (BN1 scale folded), tap-major columns
    # b1_ref   : (P, 1)        folded BN1 bias
    # w2_ref   : (P, 9*P)      conv2 weights (BN2 scale folded)
    # b2_ref   : (P, 1)        folded BN2 bias
    # mask_ref : (9*C, H*W)    per-tap zero-padding masks (tap-major rows)
    # o_ref    : (1, P, H*W)   lane-dense output (flattened NCHW)
    # patch_scr: (9*C, H*W)    f32 im2col patch scratch (reused by both convs)
    # act_scr  : (P, H*W)      f32 conv1 activation scratch
    C = x_ref.shape[1]
    HW = x_ref.shape[2]
    P = w1_ref.shape[0]

    def build_patch(load_src, n_ch):
        # Writes the masked im2col patch (9*n_ch, H*W) into patch_scr.
        # Tap (dh, dw) at output pixel i reads flat index i + dh*W + dw; the
        # precomputed mask zeroes out-of-image taps (this IS the zero padding),
        # and the tiny wrap strips are filled with zeros explicitly, so every
        # row of patch_scr is fully overwritten each conv (no stale data).
        t = 0
        for dh in (-1, 0, 1):
            for dw in (-1, 0, 1):
                s = dh * img_w + dw
                rows = pl.ds(t * n_ch, n_ch)
                if s >= 0:
                    n = HW - s
                    patch_scr[rows, pl.ds(0, n)] = (
                        load_src(s, n) * mask_ref[rows, pl.ds(0, n)])
                    if s > 0:
                        patch_scr[rows, pl.ds(n, s)] = jnp.zeros(
                            (n_ch, s), jnp.float32)
                else:
                    n = HW + s
                    patch_scr[rows, pl.ds(-s, n)] = (
                        load_src(0, n) * mask_ref[rows, pl.ds(-s, n)])
                    patch_scr[rows, pl.ds(0, -s)] = jnp.zeros(
                        (n_ch, -s), jnp.float32)
                t += 1

    # ---- conv1 (BN1 scale folded) as one im2col matmul, then bias + ReLU ----
    build_patch(lambda s, n: x_ref[0, :, pl.ds(s, n)].astype(jnp.float32), C)
    y1 = jnp.dot(w1_ref[...], patch_scr[...],
                 preferred_element_type=jnp.float32)           # (P, H*W)
    act_scr[...] = jnp.maximum(y1 + b1_ref[...], 0.0)

    # ---- conv2 (BN2 scale folded), same trick on the conv1 activation ----
    build_patch(lambda s, n: act_scr[:, pl.ds(s, n)], P)
    y2 = jnp.dot(w2_ref[...], patch_scr[...],
                 preferred_element_type=jnp.float32)           # (P, H*W)

    # ---- BN2 bias + identity shortcut + ReLU; lane-dense store ----
    x = x_ref[0].astype(jnp.float32)                           # (C, H*W)
    o_ref[0] = jnp.maximum(y2 + b2_ref[...] + x, 0.0).astype(o_ref.dtype)


def basic_block_forward(x_nchw, params):
    """Fused BasicBlock forward (stride=1, identity shortcut). x is NCHW."""
    N, C, H, W = x_nchw.shape
    P = params["w1"].shape[0]
    assert C == P, "identity shortcut requires in_planes == planes (stride=1)"
    HW = H * W

    # ---- one-time parameter prep: fold eval-mode BN scale into conv weights ----
    inv1 = params["g1"] / jnp.sqrt(params["v1"] + _EPS)        # (P,)
    inv2 = params["g2"] / jnp.sqrt(params["v2"] + _EPS)
    w1s = params["w1"] * inv1[:, None, None, None]             # (P, C, 3, 3)
    w2s = params["w2"] * inv2[:, None, None, None]             # (P, P, 3, 3)
    b1 = (params["be1"] - params["m1"] * inv1).reshape(P, 1)
    b2 = (params["be2"] - params["m2"] * inv2).reshape(P, 1)
    # (P, c, 3, 3) -> (P, 9c) with columns ordered tap-major: (kh, kw, c)
    w1m = jnp.transpose(w1s, (2, 3, 1, 0)).reshape(9 * C, P).T
    w2m = jnp.transpose(w2s, (2, 3, 1, 0)).reshape(9 * P, P).T

    # Per-tap zero-padding masks (tap-major rows, broadcast over channels).
    row = jnp.arange(H)[:, None]
    col = jnp.arange(W)[None, :]
    masks = []
    for dh in (-1, 0, 1):
        for dw in (-1, 0, 1):
            m = ((row + dh >= 0) & (row + dh < H) &
                 (col + dw >= 0) & (col + dw < W)).reshape(1, HW)
            masks.append(jnp.broadcast_to(m, (C, HW)))
    tap_mask = jnp.concatenate(masks, axis=0).astype(jnp.float32)  # (9C, HW)

    x_flat = x_nchw.reshape(N, C, HW)      # free reshape: flattened NCHW layout

    kernel = functools.partial(_basic_block_kernel, img_w=W)
    out = pl.pallas_call(
        kernel,
        out_shape=jax.ShapeDtypeStruct((N, P, HW), x_nchw.dtype),
        grid=(N,),
        in_specs=[
            pl.BlockSpec((1, C, HW), lambda n: (n, 0, 0)),
            pl.BlockSpec((P, 9 * C), lambda n: (0, 0)),
            pl.BlockSpec((P, 1), lambda n: (0, 0)),
            pl.BlockSpec((P, 9 * P), lambda n: (0, 0)),
            pl.BlockSpec((P, 1), lambda n: (0, 0)),
            pl.BlockSpec((9 * C, HW), lambda n: (0, 0)),
        ],
        out_specs=pl.BlockSpec((1, P, HW), lambda n: (n, 0, 0)),
        scratch_shapes=[
            pltpu.VMEM((9 * C, HW), jnp.float32),
            pltpu.VMEM((P, HW), jnp.float32),
        ],
        compiler_params=pltpu.CompilerParams(
            dimension_semantics=("parallel",)),
    )(x_flat, w1m, b1, w2m, b2, tap_mask)

    # (N, P, H*W) is flattened NCHW -> free reshape, no transpose needed.
    return out.reshape(N, P, H, W)


def basic_block_reference(x, params):
    """Pure-JAX reference (NCHW), mirrors PyTorch eval-mode forward."""
    dn = ("NCHW", "OIHW", "NCHW")

    def bn(y, g, b, m, v):
        g, b, m, v = (t.reshape(1, -1, 1, 1) for t in (g, b, m, v))
        return (y - m) / jnp.sqrt(v + _EPS) * g + b

    y = lax.conv_general_dilated(x, params["w1"], (1, 1), ((1, 1), (1, 1)),
                                 dimension_numbers=dn)
    y = jax.nn.relu(bn(y, params["g1"], params["be1"],
                       params["m1"], params["v1"]))
    y = lax.conv_general_dilated(y, params["w2"], (1, 1), ((1, 1), (1, 1)),
                                 dimension_numbers=dn)
    y = bn(y, params["g2"], params["be2"], params["m2"], params["v2"])
    return jax.nn.relu(y + x)


if __name__ == "__main__":
    N, C, H, W = 2, 4, 16, 16     # in_planes = planes = 4, stride = 1
    P = C

    key = jax.random.PRNGKey(0)
    ks = jax.random.split(key, 11)
    params = {
        "w1": 0.1 * jax.random.normal(ks[0], (P, C, 3, 3), jnp.float32),
        "g1": 1.0 + 0.1 * jax.random.normal(ks[1], (P,), jnp.float32),
        "be1": 0.05 * jax.random.normal(ks[2], (P,), jnp.float32),
        "m1": 0.1 * jax.random.normal(ks[3], (P,), jnp.float32),
        "v1": jax.random.uniform(ks[4], (P,), jnp.float32, 0.5, 1.5),
        "w2": 0.1 * jax.random.normal(ks[5], (P, P, 3, 3), jnp.float32),
        "g2": 1.0 + 0.1 * jax.random.normal(ks[6], (P,), jnp.float32),
        "be2": 0.05 * jax.random.normal(ks[7], (P,), jnp.float32),
        "m2": 0.1 * jax.random.normal(ks[8], (P,), jnp.float32),
        "v2": jax.random.uniform(ks[9], (P,), jnp.float32, 0.5, 1.5),
    }
    x = jax.random.normal(ks[10], (N, C, H, W), jnp.float32)

    out = jax.block_until_ready(basic_block_forward(x, params))
    ref = basic_block_reference(x, params)

    assert out.shape == ref.shape == (N, P, H, W)
    err = jnp.max(jnp.abs(out - ref))
    assert jnp.allclose(out, ref, atol=1e-3, rtol=1e-3), f"max abs err {err}"
    print("KERNEL_OK")
</pallas_src>

<mosaic_0001>
module attributes {stable_mosaic.version = 11 : i64} {
  func.func @_basic_block_kernel(%arg0: i32, %arg1: memref<1x4x256xf32, #tpu.memory_space<vmem>>, %arg2: memref<4x36xf32, #tpu.memory_space<vmem>>, %arg3: memref<4x1xf32, #tpu.memory_space<vmem>>, %arg4: memref<4x36xf32, #tpu.memory_space<vmem>>, %arg5: memref<4x1xf32, #tpu.memory_space<vmem>>, %arg6: memref<36x256xf32, #tpu.memory_space<vmem>>, %arg7: memref<1x4x256xf32, #tpu.memory_space<vmem>>, %arg8: memref<36x256xf32, #tpu.memory_space<vmem>>, %arg9: memref<4x256xf32, #tpu.memory_space<vmem>>) attributes {dimension_semantics = [#tpu.dimension_semantics<parallel>], iteration_bounds = array<i64: 2>, scalar_prefetch = 0 : i64, scratch_operands = 2 : i64, tpu.core_type = #tpu.core_type<tc>, window_params = [{transform_indices = @transform_0, window_bounds = array<i64: 1, 4, 256>}, {pipeline_mode = #tpu.pipeline_mode<synchronous>, transform_indices = @transform_1, window_bounds = array<i64: 4, 36>}, {pipeline_mode = #tpu.pipeline_mode<synchronous>, transform_indices = @transform_2, window_bounds = array<i64: 4, 1>}, {pipeline_mode = #tpu.pipeline_mode<synchronous>, transform_indices = @transform_3, window_bounds = array<i64: 4, 36>}, {pipeline_mode = #tpu.pipeline_mode<synchronous>, transform_indices = @transform_4, window_bounds = array<i64: 4, 1>}, {pipeline_mode = #tpu.pipeline_mode<synchronous>, transform_indices = @transform_5, window_bounds = array<i64: 36, 256>}, {transform_indices = @transform_6, window_bounds = array<i64: 1, 4, 256>}]} {
    %c0 = arith.constant 0 : index
    %c0_0 = arith.constant 0 : index
    %c0_1 = arith.constant 0 : index
    %0 = vector.load %arg1[%c0, %c0_0, %c0_1] : memref<1x4x256xf32, #tpu.memory_space<vmem>>, vector<1x4x239xf32>
    %1 = vector.shape_cast %0 : vector<1x4x239xf32> to vector<4x239xf32>
    %c0_2 = arith.constant 0 : index
    %c17 = arith.constant 17 : index
    %2 = vector.load %arg6[%c0_2, %c17] : memref<36x256xf32, #tpu.memory_space<vmem>>, vector<4x239xf32>
    %3 = arith.mulf %1, %2 : vector<4x239xf32>
    %c0_3 = arith.constant 0 : index
    %c17_4 = arith.constant 17 : index
    %4 = vector.load %arg8[%c0_3, %c17_4] : memref<36x256xf32, #tpu.memory_space<vmem>>, vector<4x239xf32>
    tpu.vector_store %arg8[%c0_3, %c17_4], %3 {strides = array<i32>} : memref<36x256xf32, #tpu.memory_space<vmem>>, vector<4x239xf32>,
    %cst = arith.constant 0.000000e+00 : f32
    %5 = vector.broadcast %cst : f32 to vector<4x17xf32>
    %c0_5 = arith.constant 0 : index
    %c0_6 = arith.constant 0 : index
    %6 = vector.load %arg8[%c0_5, %c0_6] : memref<36x256xf32, #tpu.memory_space<vmem>>, vector<4x17xf32>
    tpu.vector_store %arg8[%c0_5, %c0_6], %5 {strides = array<i32>} : memref<36x256xf32, #tpu.memory_space<vmem>>, vector<4x17xf32>,
    %c0_7 = arith.constant 0 : index
    %c0_8 = arith.constant 0 : index
    %c0_9 = arith.constant 0 : index
    %7 = vector.load %arg1[%c0_7, %c0_8, %c0_9] : memref<1x4x256xf32, #tpu.memory_space<vmem>>, vector<1x4x240xf32>
    %8 = vector.shape_cast %7 : vector<1x4x240xf32> to vector<4x240xf32>
    %c4 = arith.constant 4 : index
    %c16 = arith.constant 16 : index
    %9 = vector.load %arg6[%c4, %c16] : memref<36x256xf32, #tpu.memory_space<vmem>>, vector<4x240xf32>
    %10 = arith.mulf %8, %9 : vector<4x240xf32>
    %c4_10 = arith.constant 4 : index
    %c16_11 = arith.constant 16 : index
    %11 = vector.load %arg8[%c4_10, %c16_11] : memref<36x256xf32, #tpu.memory_space<vmem>>, vector<4x240xf32>
    tpu.vector_store %arg8[%c4_10, %c16_11], %10 {strides = array<i32>} : memref<36x256xf32, #tpu.memory_space<vmem>>, vector<4x240xf32>,
    %cst_12 = arith.constant 0.000000e+00 : f32
    %12 = vector.broadcast %cst_12 : f32 to vector<4x16xf32>
    %c4_13 = arith.constant 4 : index
    %c0_14 = arith.constant 0 : index
    %13 = vector.load %arg8[%c4_13, %c0_14] : memref<36x256xf32, #tpu.memory_space<vmem>>, vector<4x16xf32>
    tpu.vector_store %arg8[%c4_13, %c0_14], %12 {strides = array<i32>} : memref<36x256xf32, #tpu.memory_space<vmem>>, vector<4x16xf32>,
    %c0_15 = arith.constant 0 : index
    %c0_16 = arith.constant 0 : index
    %c0_17 = arith.constant 0 : index
    %14 = vector.load %arg1[%c0_15, %c0_16, %c0_17] : memref<1x4x256xf32, #tpu.memory_space<vmem>>, vector<1x4x241xf32>
    %15 = vector.shape_cast %14 : vector<1x4x241xf32> to vector<4x241xf32>
    %c8 = arith.constant 8 : index
    %c15 = arith.constant 15 : index
    %16 = vector.load %arg6[%c8, %c15] : memref<36x256xf32, #tpu.memory_space<vmem>>, vector<4x241xf32>
    %17 = arith.mulf %15, %16 : vector<4x241xf32>
    %c8_18 = arith.constant 8 : index
    %c15_19 = arith.constant 15 : index
    %18 = vector.load %arg8[%c8_18, %c15_19] : memref<36x256xf32, #tpu.memory_space<vmem>>, vector<4x241xf32>
    tpu.vector_store %arg8[%c8_18, %c15_19], %17 {strides = array<i32>} : memref<36x256xf32, #tpu.memory_space<vmem>>, vector<4x241xf32>,
    %cst_20 = arith.constant 0.000000e+00 : f32
    %19 = vector.broadcast %cst_20 : f32 to vector<4x15xf32>
    %c8_21 = arith.constant 8 : index
    %c0_22 = arith.constant 0 : index
    %20 = vector.load %arg8[%c8_21, %c0_22] : memref<36x256xf32, #tpu.memory_space<vmem>>, vector<4x15xf32>
    tpu.vector_store %arg8[%c8_21, %c0_22], %19 {strides = array<i32>} : memref<36x256xf32, #tpu.memory_space<vmem>>, vector<4x15xf32>,
    %c0_23 = arith.constant 0 : index
    %c0_24 = arith.constant 0 : index
    %c0_25 = arith.constant 0 : index
    %21 = vector.load %arg1[%c0_23, %c0_24, %c0_25] : memref<1x4x256xf32, #tpu.memory_space<vmem>>, vector<1x4x255xf32>
    %22 = vector.shape_cast %21 : vector<1x4x255xf32> to vector<4x255xf32>
    %c12 = arith.constant 12 : index
    %c1 = arith.constant 1 : index
    %23 = vector.load %arg6[%c12, %c1] : memref<36x256xf32, #tpu.memory_space<vmem>>, vector<4x255xf32>
    %24 = arith.mulf %22, %23 : vector<4x255xf32>
    %c12_26 = arith.constant 12 : index
    %c1_27 = arith.constant 1 : index
    %25 = vector.load %arg8[%c12_26, %c1_27] : memref<36x256xf32, #tpu.memory_space<vmem>>, vector<4x255xf32>
    tpu.vector_store %arg8[%c12_26, %c1_27], %24 {strides = array<i32>} : memref<36x256xf32, #tpu.memory_space<vmem>>, vector<4x255xf32>,
    %cst_28 = arith.constant 0.000000e+00 : f32
    %26 = vector.broadcast %cst_28 : f32 to vector<4x1xf32>
    %c12_29 = arith.constant 12 : index
    %c0_30 = arith.constant 0 : index
    %27 = vector.load %arg8[%c12_29, %c0_30] : memref<36x256xf32, #tpu.memory_space<vmem>>, vector<4x1xf32>
    tpu.vector_store %arg8[%c12_29, %c0_30], %26 {strides = array<i32>} : memref<36x256xf32, #tpu.memory_space<vmem>>, vector<4x1xf32>,
    %c0_31 = arith.constant 0 : index
    %c0_32 = arith.constant 0 : index
    %c0_33 = arith.constant 0 : index
    %28 = vector.load %arg1[%c0_31, %c0_32, %c0_33] : memref<1x4x256xf32, #tpu.memory_space<vmem>>, vector<1x4x256xf32>
    %29 = vector.shape_cast %28 : vector<1x4x256xf32> to vector<4x256xf32>
    %c16_34 = arith.constant 16 : index
    %c0_35 = arith.constant 0 : index
    %30 = vector.load %arg6[%c16_34, %c0_35] : memref<36x256xf32, #tpu.memory_space<vmem>>, vector<4x256xf32>
    %31 = arith.mulf %29, %30 : vector<4x256xf32>
    %c16_36 = arith.constant 16 : index
    %c0_37 = arith.constant 0 : index
    %32 = vector.load %arg8[%c16_36, %c0_37] : memref<36x256xf32, #tpu.memory_space<vmem>>, vector<4x256xf32>
    tpu.vector_store %arg8[%c16_36, %c0_37], %31 {strides = array<i32>} : memref<36x256xf32, #tpu.memory_space<vmem>>, vector<4x256xf32>,
    %c0_38 = arith.constant 0 : index
    %c0_39 = arith.constant 0 : index
    %c1_40 = arith.constant 1 : index
    %33 = vector.load %arg1[%c0_38, %c0_39, %c1_40] : memref<1x4x256xf32, #tpu.memory_space<vmem>>, vector<1x4x255xf32>
    %34 = vector.shape_cast %33 : vector<1x4x255xf32> to vector<4x255xf32>
    %c20 = arith.constant 20 : index
    %c0_41 = arith.constant 0 : index
    %35 = vector.load %arg6[%c20, %c0_41] : memref<36x256xf32, #tpu.memory_space<vmem>>, vector<4x255xf32>
    %36 = arith.mulf %34, %35 : vector<4x255xf32>
    %c20_42 = arith.constant 20 : index
    %c0_43 = arith.constant 0 : index
    %37 = vector.load %arg8[%c20_42, %c0_43] : memref<36x256xf32, #tpu.memory_space<vmem>>, vector<4x255xf32>
    tpu.vector_store %arg8[%c20_42, %c0_43], %36 {strides = array<i32>} : memref<36x256xf32, #tpu.memory_space<vmem>>, vector<4x255xf32>,
    %cst_44 = arith.constant 0.000000e+00 : f32
    %38 = vector.broadcast %cst_44 : f32 to vector<4x1xf32>
    %c20_45 = arith.constant 20 : index
    %c255 = arith.constant 255 : index
    %39 = vector.load %arg8[%c20_45, %c255] : memref<36x256xf32, #tpu.memory_space<vmem>>, vector<4x1xf32>
    tpu.vector_store %arg8[%c20_45, %c255], %38 {strides = array<i32>} : memref<36x256xf32, #tpu.memory_space<vmem>>, vector<4x1xf32>,
    %c0_46 = arith.constant 0 : index
    %c0_47 = arith.constant 0 : index
    %c15_48 = arith.constant 15 : index
    %40 = vector.load %arg1[%c0_46, %c0_47, %c15_48] : memref<1x4x256xf32, #tpu.memory_space<vmem>>, vector<1x4x241xf32>
    %41 = vector.shape_cast %40 : vector<1x4x241xf32> to vector<4x241xf32>
    %c24 = arith.constant 24 : index
    %c0_49 = arith.constant 0 : index
    %42 = vector.load %arg6[%c24, %c0_49] : memref<36x256xf32, #tpu.memory_space<vmem>>, vector<4x241xf32>
    %43 = arith.mulf %41, %42 : vector<4x241xf32>
    %c24_50 = arith.constant 24 : index
    %c0_51 = arith.constant 0 : index
    %44 = vector.load %arg8[%c24_50, %c0_51] : memref<36x256xf32, #tpu.memory_space<vmem>>, vector<4x241xf32>
    tpu.vector_store %arg8[%c24_50, %c0_51], %43 {strides = array<i32>} : memref<36x256xf32, #tpu.memory_space<vmem>>, vector<4x241xf32>,
    %cst_52 = arith.constant 0.000000e+00 : f32
    %45 = vector.broadcast %cst_52 : f32 to vector<4x15xf32>
    %c24_53 = arith.constant 24 : index
    %c241 = arith.constant 241 : index
    %46 = vector.load %arg8[%c24_53, %c241] : memref<36x256xf32, #tpu.memory_space<vmem>>, vector<4x15xf32>
    tpu.vector_store %arg8[%c24_53, %c241], %45 {strides = array<i32>} : memref<36x256xf32, #tpu.memory_space<vmem>>, vector<4x15xf32>,
    %c0_54 = arith.constant 0 : index
    %c0_55 = arith.constant 0 : index
    %c16_56 = arith.constant 16 : index
    %47 = vector.load %arg1[%c0_54, %c0_55, %c16_56] : memref<1x4x256xf32, #tpu.memory_space<vmem>>, vector<1x4x240xf32>
    %48 = vector.shape_cast %47 : vector<1x4x240xf32> to vector<4x240xf32>
    %c28 = arith.constant 28 : index
    %c0_57 = arith.constant 0 : index
    %49 = vector.load %arg6[%c28, %c0_57] : memref<36x256xf32, #tpu.memory_space<vmem>>, vector<4x240xf32>
    %50 = arith.mulf %48, %49 : vector<4x240xf32>
    %c28_58 = arith.constant 28 : index
    %c0_59 = arith.constant 0 : index
    %51 = vector.load %arg8[%c28_58, %c0_59] : memref<36x256xf32, #tpu.memory_space<vmem>>, vector<4x240xf32>
    tpu.vector_store %arg8[%c28_58, %c0_59], %50 {strides = array<i32>} : memref<36x256xf32, #tpu.memory_space<vmem>>, vector<4x240xf32>,
    %cst_60 = arith.constant 0.000000e+00 : f32
    %52 = vector.broadcast %cst_60 : f32 to vector<4x16xf32>
    %c28_61 = arith.constant 28 : index
    %c240 = arith.constant 240 : index
    %53 = vector.load %arg8[%c28_61, %c240] : memref<36x256xf32, #tpu.memory_space<vmem>>, vector<4x16xf32>
    tpu.vector_store %arg8[%c28_61, %c240], %52 {strides = array<i32>} : memref<36x256xf32, #tpu.memory_space<vmem>>, vector<4x16xf32>,
    %c0_62 = arith.constant 0 : index
    %c0_63 = arith.constant 0 : index
    %c17_64 = arith.constant 17 : index
    %54 = vector.load %arg1[%c0_62, %c0_63, %c17_64] : memref<1x4x256xf32, #tpu.memory_space<vmem>>, vector<1x4x239xf32>
    %55 = vector.shape_cast %54 : vector<1x4x239xf32> to vector<4x239xf32>
    %c32 = arith.constant 32 : index
    %c0_65 = arith.constant 0 : index
    %56 = vector.load %arg6[%c32, %c0_65] : memref<36x256xf32, #tpu.memory_space<vmem>>, vector<4x239xf32>
    %57 = arith.mulf %55, %56 : vector<4x239xf32>
    %c32_66 = arith.constant 32 : index
    %c0_67 = arith.constant 0 : index
    %58 = vector.load %arg8[%c32_66, %c0_67] : memref<36x256xf32, #tpu.memory_space<vmem>>, vector<4x239xf32>
    tpu.vector_store %arg8[%c32_66, %c0_67], %57 {strides = array<i32>} : memref<36x256xf32, #tpu.memory_space<vmem>>, vector<4x239xf32>,
    %cst_68 = arith.constant 0.000000e+00 : f32
    %59 = vector.broadcast %cst_68 : f32 to vector<4x17xf32>
    %c32_69 = arith.constant 32 : index
    %c239 = arith.constant 239 : index
    %60 = vector.load %arg8[%c32_69, %c239] : memref<36x256xf32, #tpu.memory_space<vmem>>, vector<4x17xf32>
    tpu.vector_store %arg8[%c32_69, %c239], %59 {strides = array<i32>} : memref<36x256xf32, #tpu.memory_space<vmem>>, vector<4x17xf32>,
    %c0_70 = arith.constant 0 : index
    %c0_71 = arith.constant 0 : index
    %61 = vector.load %arg2[%c0_70, %c0_71] : memref<4x36xf32, #tpu.memory_space<vmem>>, vector<4x36xf32>
    %c0_72 = arith.constant 0 : index
    %c0_73 = arith.constant 0 : index
    %62 = vector.load %arg8[%c0_72, %c0_73] : memref<36x256xf32, #tpu.memory_space<vmem>>, vector<36x256xf32>
    %cst_74 = arith.constant dense<0.000000e+00> : vector<4x256xf32>
    %63 = tpu.matmul %61, %62, %cst_74 {dimension_numbers = #tpu.dot_dimension_numbers<[1], [0], [0], [1], [0, 0, 1, 1], [], []>} : vector<4x36xf32>, vector<36x256xf32>, vector<4x256xf32> -> vector<4x256xf32>
    %c0_75 = arith.constant 0 : index
    %c0_76 = arith.constant 0 : index
    %64 = vector.load %arg3[%c0_75, %c0_76] : memref<4x1xf32, #tpu.memory_space<vmem>>, vector<4x1xf32>
    %65 = vector.broadcast %64 : vector<4x1xf32> to vector<4x256xf32>
    %66 = arith.addf %63, %65 : vector<4x256xf32>
    %cst_77 = arith.constant 0.000000e+00 : f32
    %67 = vector.broadcast %cst_77 : f32 to vector<4x256xf32>
    %68 = arith.maximumf %66, %67 : vector<4x256xf32>
    %c0_78 = arith.constant 0 : index
    %c0_79 = arith.constant 0 : index
    %69 = vector.load %arg9[%c0_78, %c0_79] : memref<4x256xf32, #tpu.memory_space<vmem>>, vector<4x256xf32>
    tpu.vector_store %arg9[%c0_78, %c0_79], %68 {strides = array<i32>} : memref<4x256xf32, #tpu.memory_space<vmem>>, vector<4x256xf32>,
    %c0_80 = arith.constant 0 : index
    %c0_81 = arith.constant 0 : index
    %70 = vector.load %arg9[%c0_80, %c0_81] : memref<4x256xf32, #tpu.memory_space<vmem>>, vector<4x239xf32>
    %c0_82 = arith.constant 0 : index
    %c17_83 = arith.constant 17 : index
    %71 = vector.load %arg6[%c0_82, %c17_83] : memref<36x256xf32, #tpu.memory_space<vmem>>, vector<4x239xf32>
    %72 = arith.mulf %70, %71 : vector<4x239xf32>
    %c0_84 = arith.constant 0 : index
    %c17_85 = arith.constant 17 : index
    %73 = vector.load %arg8[%c0_84, %c17_85] : memref<36x256xf32, #tpu.memory_space<vmem>>, vector<4x239xf32>
    tpu.vector_store %arg8[%c0_84, %c17_85], %72 {strides = array<i32>} : memref<36x256xf32, #tpu.memory_space<vmem>>, vector<4x239xf32>,
    %cst_86 = arith.constant 0.000000e+00 : f32
    %74 = vector.broadcast %cst_86 : f32 to vector<4x17xf32>
    %c0_87 = arith.constant 0 : index
    %c0_88 = arith.constant 0 : index
    %75 = vector.load %arg8[%c0_87, %c0_88] : memref<36x256xf32, #tpu.memory_space<vmem>>, vector<4x17xf32>
    tpu.vector_store %arg8[%c0_87, %c0_88], %74 {strides = array<i32>} : memref<36x256xf32, #tpu.memory_space<vmem>>, vector<4x17xf32>,
    %c0_89 = arith.constant 0 : index
    %c0_90 = arith.constant 0 : index
    %76 = vector.load %arg9[%c0_89, %c0_90] : memref<4x256xf32, #tpu.memory_space<vmem>>, vector<4x240xf32>
    %c4_91 = arith.constant 4 : index
    %c16_92 = arith.constant 16 : index
    %77 = vector.load %arg6[%c4_91, %c16_92] : memref<36x256xf32, #tpu.memory_space<vmem>>, vector<4x240xf32>
    %78 = arith.mulf %76, %77 : vector<4x240xf32>
    %c4_93 = arith.constant 4 : index
    %c16_94 = arith.constant 16 : index
    %79 = vector.load %arg8[%c4_93, %c16_94] : memref<36x256xf32, #tpu.memory_space<vmem>>, vector<4x240xf32>
    tpu.vector_store %arg8[%c4_93, %c16_94], %78 {strides = array<i32>} : memref<36x256xf32, #tpu.memory_space<vmem>>, vector<4x240xf32>,
    %cst_95 = arith.constant 0.000000e+00 : f32
    %80 = vector.broadcast %cst_95 : f32 to vector<4x16xf32>
    %c4_96 = arith.constant 4 : index
    %c0_97 = arith.constant 0 : index
    %81 = vector.load %arg8[%c4_96, %c0_97] : memref<36x256xf32, #tpu.memory_space<vmem>>, vector<4x16xf32>
    tpu.vector_store %arg8[%c4_96, %c0_97], %80 {strides = array<i32>} : memref<36x256xf32, #tpu.memory_space<vmem>>, vector<4x16xf32>,
    %c0_98 = arith.constant 0 : index
    %c0_99 = arith.constant 0 : index
    %82 = vector.load %arg9[%c0_98, %c0_99] : memref<4x256xf32, #tpu.memory_space<vmem>>, vector<4x241xf32>
    %c8_100 = arith.constant 8 : index
    %c15_101 = arith.constant 15 : index
    %83 = vector.load %arg6[%c8_100, %c15_101] : memref<36x256xf32, #tpu.memory_space<vmem>>, vector<4x241xf32>
    %84 = arith.mulf %82, %83 : vector<4x241xf32>
    %c8_102 = arith.constant 8 : index
    %c15_103 = arith.constant 15 : index
    %85 = vector.load %arg8[%c8_102, %c15_103] : memref<36x256xf32, #tpu.memory_space<vmem>>, vector<4x241xf32>
    tpu.vector_store %arg8[%c8_102, %c15_103], %84 {strides = array<i32>} : memref<36x256xf32, #tpu.memory_space<vmem>>, vector<4x241xf32>,
    %cst_104 = arith.constant 0.000000e+00 : f32
    %86 = vector.broadcast %cst_104 : f32 to vector<4x15xf32>
    %c8_105 = arith.constant 8 : index
    %c0_106 = arith.constant 0 : index
    %87 = vector.load %arg8[%c8_105, %c0_106] : memref<36x256xf32, #tpu.memory_space<vmem>>, vector<4x15xf32>
    tpu.vector_store %arg8[%c8_105, %c0_106], %86 {strides = array<i32>} : memref<36x256xf32, #tpu.memory_space<vmem>>, vector<4x15xf32>,
    %c0_107 = arith.constant 0 : index
    %c0_108 = arith.constant 0 : index
    %88 = vector.load %arg9[%c0_107, %c0_108] : memref<4x256xf32, #tpu.memory_space<vmem>>, vector<4x255xf32>
    %c12_109 = arith.constant 12 : index
    %c1_110 = arith.constant 1 : index
    %89 = vector.load %arg6[%c12_109, %c1_110] : memref<36x256xf32, #tpu.memory_space<vmem>>, vector<4x255xf32>
    %90 = arith.mulf %88, %89 : vector<4x255xf32>
    %c12_111 = arith.constant 12 : index
    %c1_112 = arith.constant 1 : index
    %91 = vector.load %arg8[%c12_111, %c1_112] : memref<36x256xf32, #tpu.memory_space<vmem>>, vector<4x255xf32>
    tpu.vector_store %arg8[%c12_111, %c1_112], %90 {strides = array<i32>} : memref<36x256xf32, #tpu.memory_space<vmem>>, vector<4x255xf32>,
    %cst_113 = arith.constant 0.000000e+00 : f32
    %92 = vector.broadcast %cst_113 : f32 to vector<4x1xf32>
    %c12_114 = arith.constant 12 : index
    %c0_115 = arith.constant 0 : index
    %93 = vector.load %arg8[%c12_114, %c0_115] : memref<36x256xf32, #tpu.memory_space<vmem>>, vector<4x1xf32>
    tpu.vector_store %arg8[%c12_114, %c0_115], %92 {strides = array<i32>} : memref<36x256xf32, #tpu.memory_space<vmem>>, vector<4x1xf32>,
    %c0_116 = arith.constant 0 : index
    %c0_117 = arith.constant 0 : index
    %94 = vector.load %arg9[%c0_116, %c0_117] : memref<4x256xf32, #tpu.memory_space<vmem>>, vector<4x256xf32>
    %c16_118 = arith.constant 16 : index
    %c0_119 = arith.constant 0 : index
    %95 = vector.load %arg6[%c16_118, %c0_119] : memref<36x256xf32, #tpu.memory_space<vmem>>, vector<4x256xf32>
    %96 = arith.mulf %94, %95 : vector<4x256xf32>
    %c16_120 = arith.constant 16 : index
    %c0_121 = arith.constant 0 : index
    %97 = vector.load %arg8[%c16_120, %c0_121] : memref<36x256xf32, #tpu.memory_space<vmem>>, vector<4x256xf32>
    tpu.vector_store %arg8[%c16_120, %c0_121], %96 {strides = array<i32>} : memref<36x256xf32, #tpu.memory_space<vmem>>, vector<4x256xf32>,
    %c0_122 = arith.constant 0 : index
    %c1_123 = arith.constant 1 : index
    %98 = vector.load %arg9[%c0_122, %c1_123] : memref<4x256xf32, #tpu.memory_space<vmem>>, vector<4x255xf32>
    %c20_124 = arith.constant 20 : index
    %c0_125 = arith.constant 0 : index
    %99 = vector.load %arg6[%c20_124, %c0_125] : memref<36x256xf32, #tpu.memory_space<vmem>>, vector<4x255xf32>
    %100 = arith.mulf %98, %99 : vector<4x255xf32>
    %c20_126 = arith.constant 20 : index
    %c0_127 = arith.constant 0 : index
    %101 = vector.load %arg8[%c20_126, %c0_127] : memref<36x256xf32, #tpu.memory_space<vmem>>, vector<4x255xf32>
    tpu.vector_store %arg8[%c20_126, %c0_127], %100 {strides = array<i32>} : memref<36x256xf32, #tpu.memory_space<vmem>>, vector<4x255xf32>,
    %cst_128 = arith.constant 0.000000e+00 : f32
    %102 = vector.broadcast %cst_128 : f32 to vector<4x1xf32>
    %c20_129 = arith.constant 20 : index
    %c255_130 = arith.constant 255 : index
    %103 = vector.load %arg8[%c20_129, %c255_130] : memref<36x256xf32, #tpu.memory_space<vmem>>, vector<4x1xf32>
    tpu.vector_store %arg8[%c20_129, %c255_130], %102 {strides = array<i32>} : memref<36x256xf32, #tpu.memory_space<vmem>>, vector<4x1xf32>,
    %c0_131 = arith.constant 0 : index
    %c15_132 = arith.constant 15 : index
    %104 = vector.load %arg9[%c0_131, %c15_132] : memref<4x256xf32, #tpu.memory_space<vmem>>, vector<4x241xf32>
    %c24_133 = arith.constant 24 : index
    %c0_134 = arith.constant 0 : index
    %105 = vector.load %arg6[%c24_133, %c0_134] : memref<36x256xf32, #tpu.memory_space<vmem>>, vector<4x241xf32>
    %106 = arith.mulf %104, %105 : vector<4x241xf32>
    %c24_135 = arith.constant 24 : index
    %c0_136 = arith.constant 0 : index
    %107 = vector.load %arg8[%c24_135, %c0_136] : memref<36x256xf32, #tpu.memory_space<vmem>>, vector<4x241xf32>
    tpu.vector_store %arg8[%c24_135, %c0_136], %106 {strides = array<i32>} : memref<36x256xf32, #tpu.memory_space<vmem>>, vector<4x241xf32>,
    %cst_137 = arith.constant 0.000000e+00 : f32
    %108 = vector.broadcast %cst_137 : f32 to vector<4x15xf32>
    %c24_138 = arith.constant 24 : index
    %c241_139 = arith.constant 241 : index
    %109 = vector.load %arg8[%c24_138, %c241_139] : memref<36x256xf32, #tpu.memory_space<vmem>>, vector<4x15xf32>
    tpu.vector_store %arg8[%c24_138, %c241_139], %108 {strides = array<i32>} : memref<36x256xf32, #tpu.memory_space<vmem>>, vector<4x15xf32>,
    %c0_140 = arith.constant 0 : index
    %c16_141 = arith.constant 16 : index
    %110 = vector.load %arg9[%c0_140, %c16_141] : memref<4x256xf32, #tpu.memory_space<vmem>>, vector<4x240xf32>
    %c28_142 = arith.constant 28 : index
    %c0_143 = arith.constant 0 : index
    %111 = vector.load %arg6[%c28_142, %c0_143] : memref<36x256xf32, #tpu.memory_space<vmem>>, vector<4x240xf32>
    %112 = arith.mulf %110, %111 : vector<4x240xf32>
    %c28_144 = arith.constant 28 : index
    %c0_145 = arith.constant 0 : index
    %113 = vector.load %arg8[%c28_144, %c0_145] : memref<36x256xf32, #tpu.memory_space<vmem>>, vector<4x240xf32>
    tpu.vector_store %arg8[%c28_144, %c0_145], %112 {strides = array<i32>} : memref<36x256xf32, #tpu.memory_space<vmem>>, vector<4x240xf32>,
    %cst_146 = arith.constant 0.000000e+00 : f32
    %114 = vector.broadcast %cst_146 : f32 to vector<4x16xf32>
    %c28_147 = arith.constant 28 : index
    %c240_148 = arith.constant 240 : index
    %115 = vector.load %arg8[%c28_147, %c240_148] : memref<36x256xf32, #tpu.memory_space<vmem>>, vector<4x16xf32>
    tpu.vector_store %arg8[%c28_147, %c240_148], %114 {strides = array<i32>} : memref<36x256xf32, #tpu.memory_space<vmem>>, vector<4x16xf32>,
    %c0_149 = arith.constant 0 : index
    %c17_150 = arith.constant 17 : index
    %116 = vector.load %arg9[%c0_149, %c17_150] : memref<4x256xf32, #tpu.memory_space<vmem>>, vector<4x239xf32>
    %c32_151 = arith.constant 32 : index
    %c0_152 = arith.constant 0 : index
    %117 = vector.load %arg6[%c32_151, %c0_152] : memref<36x256xf32, #tpu.memory_space<vmem>>, vector<4x239xf32>
    %118 = arith.mulf %116, %117 : vector<4x239xf32>
    %c32_153 = arith.constant 32 : index
    %c0_154 = arith.constant 0 : index
    %119 = vector.load %arg8[%c32_153, %c0_154] : memref<36x256xf32, #tpu.memory_space<vmem>>, vector<4x239xf32>
    tpu.vector_store %arg8[%c32_153, %c0_154], %118 {strides = array<i32>} : memref<36x256xf32, #tpu.memory_space<vmem>>, vector<4x239xf32>,
    %cst_155 = arith.constant 0.000000e+00 : f32
    %120 = vector.broadcast %cst_155 : f32 to vector<4x17xf32>
    %c32_156 = arith.constant 32 : index
    %c239_157 = arith.constant 239 : index
    %121 = vector.load %arg8[%c32_156, %c239_157] : memref<36x256xf32, #tpu.memory_space<vmem>>, vector<4x17xf32>
    tpu.vector_store %arg8[%c32_156, %c239_157], %120 {strides = array<i32>} : memref<36x256xf32, #tpu.memory_space<vmem>>, vector<4x17xf32>,
    %c0_158 = arith.constant 0 : index
    %c0_159 = arith.constant 0 : index
    %122 = vector.load %arg4[%c0_158, %c0_159] : memref<4x36xf32, #tpu.memory_space<vmem>>, vector<4x36xf32>
    %c0_160 = arith.constant 0 : index
    %c0_161 = arith.constant 0 : index
    %123 = vector.load %arg8[%c0_160, %c0_161] : memref<36x256xf32, #tpu.memory_space<vmem>>, vector<36x256xf32>
    %cst_162 = arith.constant dense<0.000000e+00> : vector<4x256xf32>
    %124 = tpu.matmul %122, %123, %cst_162 {dimension_numbers = #tpu.dot_dimension_numbers<[1], [0], [0], [1], [0, 0, 1, 1], [], []>} : vector<4x36xf32>, vector<36x256xf32>, vector<4x256xf32> -> vector<4x256xf32>
    %c0_163 = arith.constant 0 : index
    %c0_164 = arith.constant 0 : index
    %c0_165 = arith.constant 0 : index
    %125 = vector.load %arg1[%c0_163, %c0_164, %c0_165] : memref<1x4x256xf32, #tpu.memory_space<vmem>>, vector<1x4x256xf32>
    %126 = vector.shape_cast %125 : vector<1x4x256xf32> to vector<4x256xf32>
    %c0_166 = arith.constant 0 : index
    %c0_167 = arith.constant 0 : index
    %127 = vector.load %arg5[%c0_166, %c0_167] : memref<4x1xf32, #tpu.memory_space<vmem>>, vector<4x1xf32>
    %128 = vector.broadcast %127 : vector<4x1xf32> to vector<4x256xf32>
    %129 = arith.addf %124, %128 : vector<4x256xf32>
    %130 = arith.addf %129, %126 : vector<4x256xf32>
    %cst_168 = arith.constant 0.000000e+00 : f32
    %131 = vector.broadcast %cst_168 : f32 to vector<4x256xf32>
    %132 = arith.maximumf %130, %131 : vector<4x256xf32>
    %c0_169 = arith.constant 0 : index
    %c0_170 = arith.constant 0 : index
    %c0_171 = arith.constant 0 : index
    %133 = vector.load %arg7[%c0_169, %c0_170, %c0_171] : memref<1x4x256xf32, #tpu.memory_space<vmem>>, vector<1x4x256xf32>
    %134 = vector.shape_cast %133 : vector<1x4x256xf32> to vector<4x256xf32>
    %135 = vector.shape_cast %132 : vector<4x256xf32> to vector<1x4x256xf32>
    tpu.vector_store %arg7[%c0_169, %c0_170, %c0_171], %135 {strides = array<i32>} : memref<1x4x256xf32, #tpu.memory_space<vmem>>, vector<1x4x256xf32>,
    return
  }
  func.func @transform_0(%arg0: i32) -> (i32, i32, i32) {
    %c0_i32 = arith.constant 0 : i32
    %c0_i32_0 = arith.constant 0 : i32
    %c0_i32_1 = arith.constant 0 : i32
    return %arg0, %c0_i32, %c0_i32_0 : i32, i32, i32
  }
  func.func @transform_1(%arg0: i32) -> (i32, i32) {
    %c0_i32 = arith.constant 0 : i32
    %c0_i32_0 = arith.constant 0 : i32
    %c0_i32_1 = arith.constant 0 : i32
    return %c0_i32, %c0_i32_0 : i32, i32
  }
  func.func @transform_2(%arg0: i32) -> (i32, i32) {
    %c0_i32 = arith.constant 0 : i32
    %c0_i32_0 = arith.constant 0 : i32
    %c0_i32_1 = arith.constant 0 : i32
    return %c0_i32, %c0_i32_0 : i32, i32
  }
  func.func @transform_3(%arg0: i32) -> (i32, i32) {
    %c0_i32 = arith.constant 0 : i32
    %c0_i32_0 = arith.constant 0 : i32
    %c0_i32_1 = arith.constant 0 : i32
    return %c0_i32, %c0_i32_0 : i32, i32
  }
  func.func @transform_4(%arg0: i32) -> (i32, i32) {
    %c0_i32 = arith.constant 0 : i32
    %c0_i32_0 = arith.constant 0 : i32
    %c0_i32_1 = arith.constant 0 : i32
    return %c0_i32, %c0_i32_0 : i32, i32
  }
  func.func @transform_5(%arg0: i32) -> (i32, i32) {
    %c0_i32 = arith.constant 0 : i32
    %c0_i32_0 = arith.constant 0 : i32
    %c0_i32_1 = arith.constant 0 : i32
    return %c0_i32, %c0_i32_0 : i32, i32
  }
  func.func @transform_6(%arg0: i32) -> (i32, i32, i32) {
    %c0_i32 = arith.constant 0 : i32
    %c0_i32_0 = arith.constant 0 : i32
    %c0_i32_1 = arith.constant 0 : i32
    return %arg0, %c0_i32, %c0_i32_0 : i32, i32, i32
  }
}

</mosaic_0001>

<bundles_post_ra>
// kernel: tpu_custom_call.1
= control target key start
LH: loop header
LB: loop body
LE: loop exit
PB: predicated region body
PF: predicated region fallthrough
CT: control target
= control target key end

     0   :  { %s1637_s0 = inlined_call_operand.hbm [shape: f32[2,4,256], index: 0, kind: input, shape index: {}]   ;;  %s1638_s1 = inlined_call_operand.vmem [shape: f32[4,36], index: 1, kind: input, shape index: {}]   ;;  %s1639_s2 = inlined_call_operand.vmem [shape: f32[4,1], index: 2, kind: input, shape index: {}]   ;;  %s1640_s3 = inlined_call_operand.vmem [shape: f32[4,36], index: 3, kind: input, shape index: {}]   ;;  %s1641_s4 = inlined_call_operand.vmem [shape: f32[4,1], index: 4, kind: input, shape index: {}]   ;;  %s1642_s5 = inlined_call_operand.hbm [shape: f32[36,256], index: 5, kind: input, shape index: {}]   ;;  %s1643_s6 = inlined_call_operand.hbm [shape: f32[2,4,256], index: 6, kind: output, shape index: {}]  }
   0x1   :  { %1662 = sst [smem:[#allocation13_spill]] %s1642_s5 }
   0x2   :  { %11 = vsyncpa [#allocation5], 0 }
   0x3   :  { %13 = vsyncpa [#allocation5 + $0x1], 0 }
   0x4   :  { %14 = vsyncpa [#allocation8], 0 }
   0x5   :  { %15 = vsyncpa [#allocation6], 0 }
   0x6   :  { %17 = vsyncpa [#allocation6 + $0x1], 0  ;;  %s1314_s21 = smov 0   ;;  %s1316_s22 = smov 0  }
   0x7   :  { %s1318_s23 = smov 0   ;;  %s1320_s24 = smov 0  }
   0x8 LB: > { %s1335_s25 = sadd.s32 4294967295, %s1262_s24   ;;  %s1028_s26 = sadd.s32 4294967294, %s1262_s24   ;;  %s1262_s24 = sphi %s1320_s24, %s1696_s24   ;;  %s1258_s23 = sphi %s1318_s23, %s1695_s23   ;;  %s1254_s22 = sphi %s1316_s22, %s1694_s22   ;;  %s1250_s21 = sphi %s1314_s21, %s1693_s21  }
   0x9   : > { %p43_p0 = scmp.ne.s32.totalorder %s1254_s22, %s1250_s21  ;;  %p1644_p1 = scmp.eq.s32.totalorder %s1335_s25, 0 }
   0xa   : > { %p178_p3 = scmp.eq.s32.totalorder %s1028_s26, 1  ;;  %p1029_p5 = scmp.ge.s32.totalorder %s1262_s24, 1 }
   0xb   : > { %p1344_p4 = por %p1644_p1, %p43_p0  ;;  %p185_p7 = scmp.lt.s32.totalorder %s1262_s24, 3 }
   0xc   : > { %p1349_p6 = por %p178_p3, %p43_p0  ;;  %s1264_s30 = smov [#allocation7]  }
   0xd   : > { %s1663_s27 = scalar_select %p1344_p4, 1, 0 }
   0xe   : > { %s1664_s28 = scalar_select %p1349_p6, 1, 0 }
   0xf   : > { %p1354_p8 = pnand %p1029_p5, %p185_p7  ;;  %s209_s7 = sshll.u32 %s1264_s30, 4  ;;  %s210_s7 = int_to_ptr.vmem [resolvable:$true] %s209_s7 }
  0x10   : > { %s1368_s9 = sadd.s32 1, %s1262_s24   ;;  %s30_s10 = sadd.s32 1, %s1258_s23 }
  0x11   : > { %s1665_s29 = scalar_select %p1354_p8, 1, 0 }
  0x12   : > { %p1060_p9 = pneg %p1354_p8  ;;  %s27_s11 = ssub.s32 %s1262_s24, %s1368_s9 }
  0x13   : > { %s1151_s12 = scalar_lea.vmem %s210_s7, 1280  ;;  %p1159_p5 = scmp.lt.s32.totalorder %s210_s7, %s210_s7 }
  0x14   : > { %p1363_p11 = pnand %p1060_p9, %p1644_p1  ;;  %p1152_p13 = scmp.ne.s32.totalorder %s210_s7, %s1151_s12 }
  0x15   : > { %p1160_p7 = scmp.lt.s32.totalorder %s1151_s12, %s1151_s12 }
  0x16   : > { %p1142_p12 = pneg %p1363_p11 }
  0x17   : > { %p1161_p10 = por %p1160_p7, %p1159_p5 }
  0x18   : > { %p1154_p0 = pnand %p1152_p13, %p1142_p12 }
  0x1a   : > { %p1155_p3 = pneg %p1154_p0 }
  0x1c   : > { %p1162_p2 = pnand %p1161_p10, %p1155_p3 }
  0x1e   : > { %1165 = shalt.err (!%p1162_p2)
}
  0x1f   : > { %s1265_s13 = smov 256   ;;  %s1266_s14 = smov 16  }
  0x20   : > { %s1667_s5 = sld [smem:[#allocation13_spill]]  ;;  %p28_p9 = scmp.eq.s32.totalorder %s27_s11, 0 }
  0x21   : > { %p37_p12 = scmp.ne.s32.totalorder %s1258_s23, %s1254_s22  ;;  %p38_p10 = scmp.eq.s32.totalorder %s1262_s24, 0 }
  0x22   : > { %p1073_p2 = scmp.lt.s32.totalorder %s1262_s24, 2  ;;  %p1668_p0 = scmp.eq.s32.totalorder %s1335_s25, 1 }
  0x23   : > { %s1385_s17 = scalar_select %p28_p9, %s1258_s23, %s30_s10  }
  0x24   : > { %p39_p13 = por %p38_p10, %p37_p12  ;;  %p1389_p3 = por %p1668_p0, %p37_p12 }
  0x25   : > { %s223_s19 = sand.u32 1, %s1258_s23   ;;  %s1050_s20 = sshll.u32 %s1262_s24, 7 }
  0x26   : > { %1063 = dma.hbm_to_vmem [thread:$0]  (!%p1363_p11), %s1667_s5, 1280, %s210_s7, [#allocation8], %s1265_s13, %s1265_s13, %s1266_s14  }
  0x27   : > { %s1669_s18 = scalar_select %p1389_p3, 1, 0 }
  0x28   : > { %s1032_s26 = sshll.u32 %s223_s19, 3  ;;  %s1398_s12 = scalar_lea.hbm %s1637_s0, %s1050_s20 }
  0x29   : > { %s227_s7 = scalar_lea.vmem [#allocation4], %s1032_s26  ;;  %p1400_p11 = pnand %p1073_p2, %p39_p13 }
  0x2a   : > { %s235_s10 = sshll.u32 %s227_s7, 4  ;;  %s224_s13 = scalar_lea.sflag [#allocation5], %s223_s19  ;;  %s236_s10 = int_to_ptr.vmem [resolvable:$true] %s235_s10 }
  0x2b   : > { %s1166_s14 = scalar_lea.hbm %s1398_s12, 128  ;;  %p1168_p7 = pneg %p1400_p11 }
  0x2c   : > { %p1167_p5 = scmp.ne.s32.totalorder %s1398_s12, %s1166_s14  ;;  %s1171_s20 = scalar_lea.hbm %s1637_s0, 256 }
  0x2d   : > { %p1172_p10 = scmp.lt.s32.totalorder %s1398_s12, %s1637_s0  ;;  %p1173_p2 = scmp.lt.s32.totalorder %s1171_s20, %s1166_s14 }
  0x2e   : > { %p1169_p9 = pnand %p1168_p7, %p1167_p5 }
  0x2f   : > { %p1174_p13 = por %p1173_p2, %p1172_p10 }
  0x30   : > { %p1170_p12 = pneg %p1169_p9 }
  0x32   : > { %p1175_p0 = pnand %p1174_p13, %p1170_p12 }
  0x34   : > { %1178 = shalt.err (!%p1175_p0)
}
  0x35   : > { %s1179_s8 = scalar_lea.vmem %s236_s10, 128  ;;  %s1267_s19 = smov [#allocation4]  }
  0x36   : > { %p1180_p1 = scmp.ne.s32.totalorder %s236_s10, %s1179_s8  ;;  %s1184_s7 = sshll.u32 %s1267_s19, 4  ;;  %s1185_s7 = int_to_ptr.vmem [resolvable:$false] %s1184_s7 }
  0x37   : > { %s1186_s5 = scalar_lea.vmem %s1185_s7, 256  ;;  %p1187_p5 = scmp.lt.s32.totalorder %s236_s10, %s1185_s7 }
  0x38   : > { %p1182_p6 = pnand %p1180_p1, %p1168_p7  ;;  %p1188_p9 = scmp.lt.s32.totalorder %s1186_s5, %s1179_s8 }
  0x3a   : > { %p1183_p3 = pneg %p1182_p6  ;;  %p1189_p4 = por %p1188_p9, %p1187_p5 }
  0x3c   : > { %p1190_p8 = pnand %p1189_p4, %p1183_p3 }
  0x3e   : > { %1193 = shalt.err (!%p1190_p8)
}
  0x3f   : > { %1067 = dma.hbm_to_vmem [thread:$0]  (!%p1400_p11), %s1398_s12, 128, %s236_s10, %s224_s13  }
  0x40   : > { %p1671_p12 = scmp.ne.s32.totalorder %s1665_s29, 0 }
  0x41   : > { %s1421_s14 = sand.u32 (!%p1671_p12), 1, %s1254_s22   ;;  %p1672_p1 = scmp.ne.s32.totalorder (!%p1671_p12), %s1663_s27, 0 }
  0x42   : > { %244 = sbr.rel (%p1671_p12) target bundleno = 927 (0x39f), region = 44  ;;  %s1036_s15 = sshll.u32 (!%p1671_p12), %s1421_s14, 3 }
  0x43   : > { %s247_s16 = scalar_lea.sflag (!%p1671_p12), [#allocation5], %s1421_s14  ;;  %s1427_s5 = scalar_lea.vmem (!%p1671_p12), [#allocation4], %s1036_s15 }
  0x47   : > { %1237 = dma.done.wait (%p1672_p1), %s247_s16, 128  }
  0x48   : > { %1239 = vsyncadd (%p1672_p1), %s247_s16, 4294967168  ;;  %p1673_p4 = scmp.eq.s32.totalorder %s1335_s25, 0 }
  0x4a   : > { %1241 = dma.done.wait (%p1673_p4), [#allocation8], 1280   ;;  %p1674_p6 = pmov %p1673_p4 }
  0x4b   : > { %v1122_v0 = vld [vmem:[#allocation7 + $0x40] ss:$8 sps:$4 sm:$0xff]   ;;  %v1123_v1 = vld [vmem:[#allocation7 + $0x34] ss:$8 sps:$4 sm:$0xff]   ;;  %s1268_s29 = smov 17   ;;  %s1269_s12 = smov 16  }
  0x4c   : > { %1243 = vsyncadd (%p1674_p6), [#allocation8], 4294966016  ;;  %492 = vrot.lane.b32.xlu0 %v1122_v0, %s1268_s29  ;;  %v1124_v2 = vld [vmem:[#allocation7 + $0x30] ss:$8 sps:$4 sm:$0xff]   ;;  %466 = vrot.lane.b32.xlu1 %v1123_v1, %s1269_s12  ;;  %v1125_v3 = vld [vmem:[#allocation7 + $0x24] ss:$8 sps:$4 sm:$0xff]  }
  0x4d   : > { %s1270_s10 = smov 15   ;;  %v1127_v4 = vld [vmem:[#allocation7 + $0x10] ss:$8 sps:$4 sm:$0xff]   ;;  %s1271_s27 = smov 1   ;;  %v1126_v5 = vld [vmem:[#allocation7 + $0x14] ss:$8 sps:$4 sm:$0xff]  }
  0x4e   : > { %v1128_v6 = vld [vmem:[#allocation7] ss:$8 sps:$4 sm:$0xff]   ;;  %v1129_v7 = vld [vmem:[#allocation7 + $0x4] ss:$8 sps:$4 sm:$0xff]   ;;  %s1272_s11 = smov 113   ;;  %s1273_s13 = smov 127  }
  0x4f   : > { %s1274_s20 = smov 111   ;;  %s1275_s30 = smov 112   ;;  %v1276_v8 = vmov 0.0   ;;  %vm302_vm0 = vcmask 138240   ;;  %v1448_v10 = vld [vmem:[%s1427_s5] sm:$0xff]  ;;  %vm1660_vm1 = vcmask 130048  }
  0x50   : > { %440 = vrot.lane.b32.xlu0 %v1124_v2, %s1270_s10  ;;  %414 = vrot.lane.b32.xlu1 %v1125_v3, %s1271_s27  ;;  %vm358_vm2 = vcmask 121856   ;;  %vm386_vm3 = vcmask 7168   ;;  %v1130_v22 = vld [vmem:[#allocation7 + $0x20] ss:$8 sps:$4 sm:$0xff]   ;;  %vm376_vm4 = vcmask 1039360   ;;  %vm348_vm5 = vcmask 924672  }
  0x51   : > { %604 = vmatprep.mubr.f32.mxu0 %v1276_v8  ;;  %914 = vmatprep.mubr.f32.mxu1 %v1276_v8  ;;  %v402_v29 = vmul.f32 %v1130_v22, %v1448_v10  ;;  %vm292_vm6 = vcmask 908288   ;;  %vm320_vm7 = vcmask 916480   ;;  %v1131_v53 = vld [vmem:[#allocation7 + $0x40] ss:$8 sps:$4 sm:$0xff]   ;;  %v1277_v54 = vmov 0   ;;  %s934_s26 = scalar_lea.sflag [#allocation6], %s1421_s14 }
  0x52   : > { %1121 = vset.pattern.permute.xlu0 %v1277_v54  ;;  %v523_v55 = vld [vmem:[%s1639_s2] sm:$0xf]  ;;  %v1132_v56 = vld [vmem:[#allocation7 + $0x30] ss:$8 sps:$4 sm:$0xff]   ;;  %v1133_v57 = vld [vmem:[#allocation7 + $0x34] ss:$8 sps:$4 sm:$0xff]  }
  0x53   : > { %406 = vst [vmem:[#allocation2 + $0x20] sm:$0xf] %v402_v29  ;;  %v404_v40 = vcombine.high %v402_v29, %v402_v29  ;;  %v1134_v58 = vld [vmem:[#allocation7 + $0x24] ss:$8 sps:$4 sm:$0xff]   ;;  %v1135_v59 = vld [vmem:[#allocation7 + $0x10] ss:$8 sps:$4 sm:$0xff]  }
  0x54   : > { %345 = vrot.lane.b32.xlu0 %v1127_v4, %s1272_s11  ;;  %373 = vrot.lane.b32.xlu1 %v1126_v5, %s1273_s13  ;;  %v1136_v60 = vld [vmem:[#allocation7 + $0x14] ss:$8 sps:$4 sm:$0xff]   ;;  %v1137_v61 = vld [vmem:[#allocation7] ss:$8 sps:$4 sm:$0xff]   ;;  %v1138_v62 = vld [vmem:[#allocation7 + $0x4] ss:$8 sps:$4 sm:$0xff]  }
  0x55   : > { %407 = vst [vmem:[#allocation2 + $0x28] sm:$0xf] %v404_v40  ;;  %vm482_vm8 = vcmask 916484   ;;  %vm1654_vm9 = vcmask 1048452   ;;  %vm430_vm10 = vcmask 1039364   ;;  %vm1648_vm11 = vcmask 1048572  }
  0x56   : > { %vm1649_vm12 = vcmask 1043576   ;;  %vm1651_vm13 = vcmask 117760   ;;  %vm1650_vm14 = vcmask 1043592   ;;  %vm1653_vm15 = vcmask 134144   ;;  %p1690_p3 = scmp.ne.s32.totalorder %s1669_s18, 0  ;;  %s1278_s19 = smov [#allocation9]  }
  0x58   : > { %289 = vrot.lane.b32.xlu0 %v1128_v6, %s1274_s20  ;;  %317 = vrot.lane.b32.xlu1 %v1129_v7, %s1275_s30 }
  0xbe   : > { %v493_v9 = vpop.permute.xlu0 %492  ;;  %v467_v12 = vpop.permute.xlu1 %466 }
  0xbf   : > { %v494_v11 = vrot.slane %v493_v9, 4  ;;  %v468_v13 = vrot.slane %v467_v12, 4 }
  0xc1   : > { %v495_v14 = vsel %vm302_vm0, %v494_v11, %v493_v9  ;;  %v469_v17 = vsel %vm1660_vm1, %v468_v13, %v467_v12 }
  0xc2   : > { %v497_v15 = vmul.f32 %v495_v14, %v1448_v10  ;;  %v441_v16 = vpop.permute.xlu0 %440  ;;  %v415_v19 = vpop.permute.xlu1 %414  ;;  %v471_v23 = vmul.f32 %v1448_v10, %v469_v17 }
  0xc3   : > { %v442_v18 = vrot.slane %v441_v16, 4  ;;  %v416_v20 = vrot.slane %v415_v19, 4 }
  0xc4   : > { %500 = vrot.lane.b32.xlu1 %v497_v15, %s1274_s20  ;;  %v473_v39 = vcombine.low %v471_v23, %v471_v23  ;;  %v499_v44 = vcombine.high %v497_v15, %v497_v15 }
  0xc5   : > { %v443_v21 = vsel %vm358_vm2, %v442_v18, %v441_v16  ;;  %v417_v26 = vsel %vm386_vm3, %v416_v20, %v415_v19 }
  0xc6   : > { %v445_v24 = vmul.f32 %v1448_v10, %v443_v21  ;;  %v346_v25 = vpop.permute.xlu0 %345  ;;  %v374_v27 = vpop.permute.xlu1 %373  ;;  %v419_v31 = vmul.f32 %v1448_v10, %v417_v26 }
  0xc7   : > { %v347_v28 = vrot.slane %v346_v25, 4  ;;  %v375_v30 = vrot.slane %v374_v27, 4 }
  0xc8   : > { %476 = vrot.lane.b32.xlu1 %v471_v23, %s1275_s30  ;;  %448 = vrot.lane.b32.xlu0 %v445_v24, %s1272_s11  ;;  %v421_v42 = vcombine.low %v419_v31, %v419_v31  ;;  %v447_v48 = vcombine.high %v445_v24, %v445_v24 }
  0xc9   : > { %v377_v32 = vsel %vm376_vm4, %v374_v27, %v375_v30  ;;  %v349_v35 = vsel %vm348_vm5, %v346_v25, %v347_v28 }
  0xca   : > { %v290_v33 = vpop.permute.xlu0 %289  ;;  %v379_v34 = vmul.f32 %v1448_v10, %v377_v32  ;;  %v351_v37 = vmul.f32 %v1448_v10, %v349_v35  ;;  %v318_v43 = vpop.permute.xlu1 %317  ;;  %v512_v35 = vld [vmem:[%s1638_s1] sm:$0xf] }
  0xcb   : > { %v291_v36 = vrot.slane %v290_v33, 4  ;;  %v319_v45 = vrot.slane %v318_v43, 4 }
  0xcc   : > { %424 = vrot.lane.b32.xlu0 %v419_v31, %s1273_s13  ;;  %384 = vrot.lane.b32.xlu1 %v379_v34, %s1271_s27  ;;  %v353_v46 = vcombine.high %v351_v37, %v351_v37  ;;  %v381_v51 = vcombine.low %v379_v34, %v379_v34 }
  0xcd   : > { %v293_v38 = vsel %vm292_vm6, %v290_v33, %v291_v36  ;;  %v321_v47 = vsel %vm320_vm7, %v318_v43, %v319_v45 }
  0xce   : > { %v295_v41 = vmul.f32 %v1448_v10, %v293_v38  ;;  %v323_v50 = vmul.f32 %v1448_v10, %v321_v47 }
  0xd0   : > { %354 = vrot.lane.b32.xlu0 %v351_v37, %s1270_s10  ;;  %474 = vrot.lane.b32.xlu1 %v473_v39, %s1275_s30  ;;  %v297_v49 = vcombine.high %v295_v41, %v295_v41  ;;  %v325_v52 = vcombine.low %v323_v50, %v323_v50 }
  0xd4   : > { %298 = vrot.lane.b32.xlu0 %v295_v41, %s1268_s29  ;;  %422 = vrot.lane.b32.xlu1 %v421_v42, %s1273_s13 }
  0xd8   : > { %502 = vrot.lane.b32.xlu0 %v499_v44, %s1274_s20  ;;  %356 = vrot.lane.b32.xlu1 %v353_v46, %s1270_s10 }
  0xdc   : > { %450 = vrot.lane.b32.xlu0 %v447_v48, %s1272_s11  ;;  %300 = vrot.lane.b32.xlu1 %v297_v49, %s1268_s29  ;;  %v1139_v49 = vld [vmem:[#allocation7 + $0x20] ss:$8 sps:$4 sm:$0xff]  }
  0xe0   : > { %382 = vrot.lane.b32.xlu0 %v381_v51, %s1271_s27  ;;  %328 = vrot.lane.b32.xlu1 %v323_v50, %s1269_s12 }
  0xe4   : > { %326 = vrot.lane.b32.xlu0 %v325_v52, %s1269_s12  ;;  %805 = vrot.lane.b32.xlu1 %v1131_v53, %s1268_s29 }
  0xe8   : > { %526 = vperm.xlu0 %1121, %v523_v55   ;;  %757 = vrot.lane.b32.xlu1 %v1132_v56, %s1270_s10 }
  0xec   : > { %781 = vrot.lane.b32.xlu0 %v1133_v57, %s1269_s12  ;;  %733 = vrot.lane.b32.xlu1 %v1134_v58, %s1271_s27 }
  0xf0   : > { %672 = vrot.lane.b32.xlu0 %v1135_v59, %s1272_s11  ;;  %696 = vrot.lane.b32.xlu1 %v1136_v60, %s1273_s13 }
  0xf4   : > { %624 = vrot.lane.b32.xlu0 %v1137_v61, %s1274_s20  ;;  %648 = vrot.lane.b32.xlu1 %v1138_v62, %s1275_s30 }
 0x136   : > { %v501_v63 = vpop.permute.xlu1 %500 }
 0x13a   : > { %v477_v0 = vpop.permute.xlu1 %476  ;;  %v449_v1 = vpop.permute.xlu0 %448 }
 0x13b   : > { %483 = vst.msk [vmem:[#allocation2 + $0x38] sm:$0xf0] %vm482_vm8, %v477_v0 }
 0x13c   : > { %485 = vst.msk [vmem:[#allocation2 + $0x38] sm:$0xf0] %vm1654_vm9, %v1276_v8  ;;  %vm1661_vm9 = vcmask 1043456  }
 0x13e   : > { %v425_v2 = vpop.permute.xlu0 %424  ;;  %v385_v3 = vpop.permute.xlu1 %384 }
 0x13f   : > { %431 = vst.msk [vmem:[#allocation2 + $0x28] sm:$0xf0] %vm430_vm10, %v425_v2 }
 0x140   : > { %433 = vst.msk [vmem:[#allocation2 + $0x28] sm:$0xf0] %vm1648_vm11, %v1276_v8  ;;  %vm1652_vm11 = vcmask 904192  }
 0x142   : > { %v355_v4 = vpop.permute.xlu0 %354  ;;  %v475_v5 = vpop.permute.xlu1 %474 }
 0x143   : > { %363 = vst.msk [vmem:[#allocation2 + $0x10] sm:$0xf] %vm1649_vm12, %v355_v4  ;;  %v478_v6 = vsel %vm320_vm7, %v475_v5, %v477_v0  ;;  %vm510_vm12 = vcmask 1044344  }
 0x144   : > { %366 = vst.msk [vmem:[#allocation2 + $0x10] sm:$0xf] %vm1651_vm13, %v1276_v8  ;;  %481 = vst [vmem:[#allocation2 + $0x30] sm:$0xf0] %v478_v6  ;;  %vm1655_vm13 = vcmask 1044360  }
 0x146   : > { %v299_v7 = vpop.permute.xlu0 %298  ;;  %v423_v9 = vpop.permute.xlu1 %422 }
 0x147   : > { %307 = vst.msk [vmem:[#allocation2] sm:$0xf] %vm1650_vm14, %v299_v7  ;;  %v426_v11 = vsel %vm376_vm4, %v423_v9, %v425_v2  ;;  %vm1656_vm14 = vcmask 920576   ;;  %v518_v29 = vld [vmem:[#allocation2 + $0x28] sm:$0xff] }
 0x148   : > { %310 = vst.msk [vmem:[#allocation2] sm:$0xf] %vm1653_vm15, %v1276_v8  ;;  %429 = vst [vmem:[#allocation2 + $0x20] sm:$0xf0] %v426_v11  ;;  %vm393_vm15 = vcmask 7172  }
 0x14a   : > { %v503_v12 = vpop.permute.xlu0 %502  ;;  %v357_v13 = vpop.permute.xlu1 %356 }
 0x14b   : > { %v504_v14 = vsel %vm292_vm6, %v501_v63, %v503_v12  ;;  %509 = vst.msk [vmem:[#allocation2 + $0x48] sm:$0xf] %vm1652_vm11, %v503_v12  ;;  %v359_v15 = vsel %vm358_vm2, %v355_v4, %v357_v13  ;;  %vm390_vm11 = vcmask 1047564  }
 0x14c   : > { %507 = vst [vmem:[#allocation2 + $0x40] sm:$0xf] %v504_v14  ;;  %511 = vst.msk [vmem:[#allocation2 + $0x48] sm:$0xf] %vm510_vm12, %v1276_v8 }
 0x14d   : > { %364 = vst [vmem:[#allocation2 + $0x18] sm:$0xf] %v359_v15 }
 0x14e   : > { %v451_v16 = vpop.permute.xlu0 %450  ;;  %v301_v18 = vpop.permute.xlu1 %300 }
 0x14f   : > { %v452_v17 = vsel %vm348_vm5, %v449_v1, %v451_v16  ;;  %457 = vst.msk [vmem:[#allocation2 + $0x38] sm:$0xf] %vm1656_vm14, %v451_v16  ;;  %v303_v19 = vsel %vm302_vm0, %v299_v7, %v301_v18  ;;  %vm1659_vm14 = vcmask 130052   ;;  %v517_v30 = vld [vmem:[#allocation2 + $0x20] sm:$0xff] }
 0x150   : > { %455 = vst [vmem:[#allocation2 + $0x30] sm:$0xf] %v452_v17  ;;  %459 = vst.msk [vmem:[#allocation2 + $0x38] sm:$0xf] %vm1655_vm13, %v1276_v8  ;;  %vm1657_vm13 = vcmask 1047684  }
 0x151   : > { %308 = vst [vmem:[#allocation2 + $0x8] sm:$0xf] %v303_v19 }
 0x152   : > { %v383_v20 = vpop.permute.xlu0 %382  ;;  %v329_v24 = vpop.permute.xlu1 %328 }
 0x153   : > { %v387_v21 = vsel %vm386_vm3, %v383_v20, %v385_v3  ;;  %391 = vst.msk [vmem:[#allocation2 + $0x10] sm:$0xf0] %vm390_vm11, %v383_v20  ;;  %v522_v22 = vld [vmem:[#allocation2 + $0x48] sm:$0xf]  ;;  %v521_v23 = vld [vmem:[#allocation2 + $0x40] sm:$0xf] }
 0x154   : > { %392 = vst [vmem:[#allocation2 + $0x18] sm:$0xf0] %v387_v21  ;;  %394 = vst.msk [vmem:[#allocation2 + $0x10] sm:$0xf0] %vm393_vm15, %v1276_v8  ;;  %1039 = vmatprep.subr.msk.mxu0 %vm1661_vm9, %v522_v22 }
 0x155   : > { %1040 = vmatpush1.msk.msra.mxu0 %vm1661_vm9, %v521_v23  ;;  %vm1678_vm9 = vcmask 117760  }
 0x156   : > { %v327_v25 = vpop.permute.xlu0 %326  ;;  %v806_v36 = vpop.permute.xlu1 %805 }
 0x157   : > { %v331_v26 = vsel %vm1660_vm1, %v327_v25, %v329_v24  ;;  %335 = vst.msk [vmem:[#allocation2] sm:$0xf0] %vm1657_vm13, %v327_v25  ;;  %v520_v27 = vld [vmem:[#allocation2 + $0x38] sm:$0xff]  ;;  %v519_v28 = vld [vmem:[#allocation2 + $0x30] sm:$0xff]  ;;  %vm1658_vm13 = vcmask 293888   ;;  %v807_v45 = vrot.slane %v806_v36, 4 }
 0x158   : > { %336 = vst [vmem:[#allocation2 + $0x8] sm:$0xf0] %v331_v26  ;;  %338 = vst.msk [vmem:[#allocation2] sm:$0xf0] %vm1659_vm14, %v1276_v8  ;;  %564 = vmatprep.subr.mxu0 %v520_v27  ;;  %v835_v25 = vld [vmem:[%s1641_s4] sm:$0xf] }
 0x159   : > { %565 = vmatpush1.msra.mxu0 %v519_v28  ;;  %v808_v54 = vsel %vm302_vm0, %v807_v45, %v806_v36  ;;  %vm1676_vm14 = vcmask 1048572  }
 0x15a   : > { %566 = vmatprep.subr.mxu0 %v518_v29  ;;  %v758_v38 = vpop.permute.xlu1 %757 }
 0x15b   : > { %567 = vmatpush1.msra.mxu0 %v517_v30  ;;  %v516_v31 = vld [vmem:[#allocation2 + $0x18] sm:$0xff]  ;;  %v515_v32 = vld [vmem:[#allocation2 + $0x10] sm:$0xff]  ;;  %v759_v46 = vrot.slane %v758_v38, 4 }
 0x15c   : > { %568 = vmatprep.subr.mxu0 %v516_v31 }
 0x15d   : > { %569 = vmatpush1.msra.mxu0 %v515_v32  ;;  %v760_v55 = vsel %vm358_vm2, %v759_v46, %v758_v38 }
 0x15e   : > { %v734_v43 = vpop.permute.xlu1 %733 }
 0x15f   : > { %v514_v33 = vld [vmem:[#allocation2 + $0x8] sm:$0xff]  ;;  %v513_v34 = vld [vmem:[#allocation2] sm:$0xff]  ;;  %v735_v52 = vrot.slane %v734_v43, 4 }
 0x160   : > { %570 = vmatprep.subr.mxu0 %v514_v33 }
 0x161   : > { %571 = vmatpush1.msra.mxu0 %v513_v34  ;;  %v736_v62 = vsel %vm386_vm3, %v735_v52, %v734_v43 }
 0x162   : > { %1041 = vmatmul.mubr.msk.f32.vlgmr.msra.gmra.mxu0 %vm1658_vm13, %v512_v35  ;;  %v697_v56 = vpop.permute.xlu1 %696  ;;  %vm1675_vm13 = vcmask 1048452  }
 0x163   : > { %v527_v37 = vpop.permute.xlu0 %526  ;;  %v698_v60 = vrot.slane %v697_v56, 4 }
 0x165   : > { %v699_v3 = vsel %vm376_vm4, %v697_v56, %v698_v60  ;;  %v823_v60 = vld [vmem:[%s1640_s3] sm:$0xf] }
 0x166   : > { %v649_v14 = vpop.permute.xlu1 %648 }
 0x167   : > { %v782_v39 = vpop.permute.xlu0 %781  ;;  %v650_v17 = vrot.slane %v649_v14, 4 }
 0x168   : > { %v783_v50 = vrot.slane %v782_v39, 4 }
 0x169   : > { %v651_v20 = vsel %vm320_vm7, %v649_v14, %v650_v17 }
 0x16a   : > { %v784_v59 = vsel %vm1660_vm1, %v783_v50, %v782_v39  ;;  %vm1677_vm1 = vcmask 1043576  }
 0x16b   : > { %v673_v51 = vpop.permute.xlu0 %672 }
 0x16c   : > { %v674_v63 = vrot.slane %v673_v51, 4 }
 0x16e   : > { %v675_v5 = vsel %vm348_vm5, %v673_v51, %v674_v63  ;;  %v922_v63 = vcombine.high %v1448_v10, %v1448_v10 }
 0x16f   : > { %v625_v0 = vpop.permute.xlu0 %624 }
 0x170   : > { %v626_v6 = vrot.slane %v625_v0, 4 }
 0x172   : > { %v627_v11 = vsel %vm292_vm6, %v625_v0, %v626_v6 }
 0x222   : > { %v606_v40 = vpop.f32.mrf.mxu0 }
 0x223   : > { %v607_v41 = vadd.f32 %v606_v40, %v527_v37 }
 0x224   : > { %v608_v42 = vpop.f32.mrf.mxu0 }
 0x225   : > { %v609_v44 = vadd.f32 %v608_v42, %v527_v37  ;;  %v611_v47 = vmax.f32 %v607_v41, 0.0 }
 0x227   : > { %v612_v48 = vmax.f32 %v609_v44, 0.0 }
 0x229   : > { %v615_v53 = vcombine.low %v611_v47, %v612_v48 }
 0x22b   : > { %v721_v57 = vmul.f32 %v1139_v49, %v615_v53  ;;  %v810_v58 = vmul.f32 %v808_v54, %v615_v53  ;;  %v762_v61 = vmul.f32 %v760_v55, %v615_v53  ;;  %v786_v1 = vmul.f32 %v784_v59, %v615_v53 }
 0x22c   : > { %v738_v4 = vmul.f32 %v736_v62, %v615_v53  ;;  %v701_v7 = vmul.f32 %v699_v3, %v615_v53  ;;  %v677_v9 = vmul.f32 %v675_v5, %v615_v53  ;;  %v629_v13 = vmul.f32 %v627_v11, %v615_v53 }
 0x22d   : > { %725 = vst [vmem:[#allocation2 + $0x20] sm:$0xf] %v721_v57  ;;  %813 = vrot.lane.b32.xlu1 %v810_v58, %s1274_s20  ;;  %765 = vrot.lane.b32.xlu0 %v762_v61, %s1272_s11  ;;  %v723_v2 = vcombine.high %v721_v57, %v721_v57  ;;  %v788_v12 = vcombine.low %v786_v1, %v786_v1 }
 0x22e   : > { %v740_v15 = vcombine.low %v738_v4, %v738_v4  ;;  %v812_v16 = vcombine.high %v810_v58, %v810_v58  ;;  %v679_v18 = vcombine.high %v677_v9, %v677_v9  ;;  %v764_v19 = vcombine.high %v762_v61, %v762_v61 }
 0x22f   : > { %726 = vst [vmem:[#allocation2 + $0x28] sm:$0xf] %v723_v2  ;;  %v631_v21 = vcombine.high %v629_v13, %v629_v13  ;;  %v653_v22 = vmul.f32 %v651_v20, %v615_v53  ;;  %v703_v23 = vcombine.low %v701_v7, %v701_v7 }
 0x231   : > { %791 = vrot.lane.b32.xlu1 %v786_v1, %s1275_s30  ;;  %743 = vrot.lane.b32.xlu0 %v738_v4, %s1273_s13  ;;  %v655_v24 = vcombine.low %v653_v22, %v653_v22 }
 0x235   : > { %706 = vrot.lane.b32.xlu1 %v701_v7, %s1271_s27  ;;  %680 = vrot.lane.b32.xlu0 %v677_v9, %s1270_s10 }
 0x239   : > { %789 = vrot.lane.b32.xlu1 %v788_v12, %s1275_s30  ;;  %632 = vrot.lane.b32.xlu0 %v629_v13, %s1268_s29 }
 0x23d   : > { %741 = vrot.lane.b32.xlu1 %v740_v15, %s1273_s13  ;;  %815 = vrot.lane.b32.xlu0 %v812_v16, %s1274_s20 }
 0x241   : > { %682 = vrot.lane.b32.xlu1 %v679_v18, %s1270_s10  ;;  %767 = vrot.lane.b32.xlu0 %v764_v19, %s1272_s11  ;;  %s1051_s10 = sshll.u32 %s1335_s25, 7  ;;  %s1198_s25 = sshll.u32 %s1278_s19, 4  ;;  %s1199_s25 = int_to_ptr.vmem [resolvable:$false] %s1198_s25 }
 0x242   : > { %s946_s30 = scalar_lea.hbm %s1643_s6, %s1051_s10 }
 0x245   : > { %634 = vrot.lane.b32.xlu1 %v631_v21, %s1268_s29  ;;  %704 = vrot.lane.b32.xlu0 %v703_v23, %s1271_s27  ;;  %s282_s27 = scalar_lea.vmem [#allocation9], %s1036_s15  ;;  %s1200_s15 = scalar_lea.vmem %s1199_s25, 256 }
 0x246   : > { %s948_s11 = sshll.u32 %s282_s27, 4  ;;  %s949_s11 = int_to_ptr.vmem [resolvable:$true] %s948_s11 }
 0x247   : > { %s1194_s8 = scalar_lea.vmem %s949_s11, 128  ;;  %p1201_p10 = scmp.lt.s32.totalorder %s949_s11, %s1199_s25 }
 0x248   : > { %p1195_p8 = scmp.ne.s32.totalorder %s949_s11, %s1194_s8  ;;  %p1202_p2 = scmp.lt.s32.totalorder %s1200_s15, %s1194_s8 }
 0x249   : > { %658 = vrot.lane.b32.xlu1 %v653_v22, %s1269_s12  ;;  %656 = vrot.lane.b32.xlu0 %v655_v24, %s1269_s12 }
 0x24a   : > { %p1196_p11 = pnand %p1195_p8, %p1690_p3  ;;  %p1203_p13 = por %p1202_p2, %p1201_p10 }
 0x24c   : > { %p1197_p7 = pneg %p1196_p11 }
 0x24d   : > { %838 = vperm.xlu0 %1121, %v835_v25  }
 0x24e   : > { %p1204_p0 = pnand %p1203_p13, %p1197_p7 }
 0x29f   : > { %v814_v26 = vpop.permute.xlu1 %813  ;;  %v766_v27 = vpop.permute.xlu0 %765 }
 0x2a3   : > { %v792_v28 = vpop.permute.xlu1 %791  ;;  %v744_v29 = vpop.permute.xlu0 %743 }
 0x2a4   : > { %797 = vst.msk [vmem:[#allocation2 + $0x38] sm:$0xf0] %vm482_vm8, %v792_v28  ;;  %vm1679_vm8 = vcmask 1043592  }
 0x2a5   : > { %749 = vst.msk [vmem:[#allocation2 + $0x28] sm:$0xf0] %vm430_vm10, %v744_v29  ;;  %vm1680_vm10 = vcmask 134144  }
 0x2a6   : > { %798 = vst.msk [vmem:[#allocation2 + $0x38] sm:$0xf0] %vm1675_vm13, %v1276_v8 }
 0x2a7   : > { %750 = vst.msk [vmem:[#allocation2 + $0x28] sm:$0xf0] %vm1676_vm14, %v1276_v8  ;;  %v707_v30 = vpop.permute.xlu1 %706  ;;  %v681_v31 = vpop.permute.xlu0 %680 }
 0x2a8   : > { %687 = vst.msk [vmem:[#allocation2 + $0x10] sm:$0xf] %vm1677_vm1, %v681_v31  ;;  %vm1681_vm1 = vcmask 904192  }
 0x2a9   : > { %689 = vst.msk [vmem:[#allocation2 + $0x10] sm:$0xf] %vm1678_vm9, %v1276_v8  ;;  %vm1689_vm9 = vcmask 293888  }
 0x2ab   : > { %v790_v32 = vpop.permute.xlu1 %789  ;;  %v633_v33 = vpop.permute.xlu0 %632 }
 0x2ac   : > { %v793_v34 = vsel %vm320_vm7, %v790_v32, %v792_v28  ;;  %639 = vst.msk [vmem:[#allocation2] sm:$0xf] %vm1679_vm8, %v633_v33  ;;  %vm1682_vm7 = vcmask 920576  }
 0x2ad   : > { %796 = vst [vmem:[#allocation2 + $0x30] sm:$0xf0] %v793_v34  ;;  %641 = vst.msk [vmem:[#allocation2] sm:$0xf] %vm1680_vm10, %v1276_v8 }
 0x2ae   : > { %v829_v54 = vld [vmem:[#allocation2 + $0x28] sm:$0xff] }
 0x2af   : > { %v742_v35 = vpop.permute.xlu1 %741  ;;  %v816_v36 = vpop.permute.xlu0 %815 }
 0x2b0   : > { %v745_v37 = vsel %vm376_vm4, %v742_v35, %v744_v29  ;;  %v817_v38 = vsel %vm292_vm6, %v814_v26, %v816_v36  ;;  %821 = vst.msk [vmem:[#allocation2 + $0x48] sm:$0xf] %vm1681_vm1, %v816_v36  ;;  %vm1683_vm4 = vcmask 1044360   ;;  %vm1686_vm6 = vcmask 1047684  }
 0x2b1   : > { %748 = vst [vmem:[#allocation2 + $0x20] sm:$0xf0] %v745_v37  ;;  %820 = vst [vmem:[#allocation2 + $0x40] sm:$0xf] %v817_v38 }
 0x2b2   : > { %822 = vst.msk [vmem:[#allocation2 + $0x48] sm:$0xf] %vm510_vm12, %v1276_v8 }
 0x2b3   : > { %v683_v39 = vpop.permute.xlu1 %682  ;;  %v768_v40 = vpop.permute.xlu0 %767 }
 0x2b4   : > { %v684_v41 = vsel %vm358_vm2, %v681_v31, %v683_v39  ;;  %v769_v42 = vsel %vm348_vm5, %v766_v27, %v768_v40  ;;  %773 = vst.msk [vmem:[#allocation2 + $0x38] sm:$0xf] %vm1682_vm7, %v768_v40  ;;  %vm1684_vm2 = vcmask 1043456  }
 0x2b5   : > { %688 = vst [vmem:[#allocation2 + $0x18] sm:$0xf] %v684_v41  ;;  %772 = vst [vmem:[#allocation2 + $0x30] sm:$0xf] %v769_v42 }
 0x2b6   : > { %774 = vst.msk [vmem:[#allocation2 + $0x38] sm:$0xf] %vm1683_vm4, %v1276_v8  ;;  %vm1685_vm5 = vmmov %vm1684_vm2 }
 0x2b7   : > { %v635_v43 = vpop.permute.xlu1 %634  ;;  %v705_v44 = vpop.permute.xlu0 %704 }
 0x2b8   : > { %v636_v45 = vsel %vm302_vm0, %v633_v33, %v635_v43  ;;  %v708_v46 = vsel %vm386_vm3, %v705_v44, %v707_v30  ;;  %711 = vst.msk [vmem:[#allocation2 + $0x10] sm:$0xf0] %vm390_vm11, %v705_v44  ;;  %v832_v48 = vld [vmem:[#allocation2 + $0x40] sm:$0xf]  ;;  %vm1687_vm0 = vcmask 130048   ;;  %vm1688_vm3 = vcmask 130052  }
 0x2b9   : > { %640 = vst [vmem:[#allocation2 + $0x8] sm:$0xf] %v636_v45  ;;  %v833_v47 = vld [vmem:[#allocation2 + $0x48] sm:$0xf]  ;;  %712 = vst [vmem:[#allocation2 + $0x18] sm:$0xf0] %v708_v46 }
 0x2ba   : > { %713 = vst.msk [vmem:[#allocation2 + $0x10] sm:$0xf0] %vm393_vm15, %v1276_v8  ;;  %1042 = vmatprep.subr.msk.mxu1 %vm1684_vm2, %v833_v47  ;;  %v828_v55 = vld [vmem:[#allocation2 + $0x20] sm:$0xff] }
 0x2bb   : > { %1043 = vmatpush1.msk.msra.mxu1 %vm1685_vm5, %v832_v48  ;;  %v659_v49 = vpop.permute.xlu1 %658  ;;  %v657_v50 = vpop.permute.xlu0 %656 }
 0x2bc   : > { %663 = vst.msk [vmem:[#allocation2] sm:$0xf0] %vm1686_vm6, %v657_v50  ;;  %v660_v51 = vsel %vm1687_vm0, %v657_v50, %v659_v49  ;;  %v830_v53 = vld [vmem:[#allocation2 + $0x30] sm:$0xff] }
 0x2bd   : > { %v831_v52 = vld [vmem:[#allocation2 + $0x38] sm:$0xff]  ;;  %665 = vst.msk [vmem:[#allocation2] sm:$0xf0] %vm1688_vm3, %v1276_v8  ;;  %664 = vst [vmem:[#allocation2 + $0x8] sm:$0xf0] %v660_v51 }
 0x2be   : > { %874 = vmatprep.subr.mxu1 %v831_v52 }
 0x2bf   : > { %875 = vmatpush1.msra.mxu1 %v830_v53 }
 0x2c0   : > { %876 = vmatprep.subr.mxu1 %v829_v54  ;;  %v827_v56 = vld [vmem:[#allocation2 + $0x18] sm:$0xff] }
 0x2c1   : > { %877 = vmatpush1.msra.mxu1 %v828_v55  ;;  %v826_v57 = vld [vmem:[#allocation2 + $0x10] sm:$0xff] }
 0x2c2   : > { %878 = vmatprep.subr.mxu1 %v827_v56 }
 0x2c3   : > { %879 = vmatpush1.msra.mxu1 %v826_v57 }
 0x2c4   : > { %v825_v58 = vld [vmem:[#allocation2 + $0x8] sm:$0xff]  ;;  %v824_v59 = vld [vmem:[#allocation2] sm:$0xff] }
 0x2c5   : > { %880 = vmatprep.subr.mxu1 %v825_v58 }
 0x2c6   : > { %881 = vmatpush1.msra.mxu1 %v824_v59 }
 0x2c7   : > { %1044 = vmatmul.mubr.msk.f32.vlgmr.msra.gmra.mxu1 %vm1689_vm9, %v823_v60 }
 0x2c8   : > { %v839_v8 = vpop.permute.xlu0 %838 }
 0x387   : > { %v916_v61 = vpop.f32.mrf.mxu1 }
 0x388   : > { %v917_v62 = vadd.f32 %v916_v61, %v839_v8 }
 0x389   : > { %v918_v0 = vpop.f32.mrf.mxu1 }
 0x38a   : > { %v924_v1 = vadd.f32 %v917_v62, %v1448_v10  ;;  %v919_v2 = vadd.f32 %v918_v0, %v839_v8 }
 0x38c   : > { %v925_v3 = vadd.f32 %v922_v63, %v919_v2  ;;  %v926_v4 = vmax.f32 %v924_v1, 0.0 }
 0x38e   : > { %v927_v5 = vmax.f32 %v925_v3, 0.0 }
 0x390   : > { %v930_v6 = vcombine.low %v926_v4, %v927_v5 }
 0x392   : > { %932 = vst [vmem:[%s282_s27] sm:$0xff] %v930_v6 }
 0x393   : > { %1207 = shalt.err (!%p1204_p0)
}
 0x394   : > { %s1208_s7 = scalar_lea.hbm %s946_s30, 128  ;;  %s1212_s5 = scalar_lea.hbm %s1643_s6, 256 }
 0x395   : > { %p1209_p5 = scmp.ne.s32.totalorder %s946_s30, %s1208_s7  ;;  %p1213_p1 = scmp.lt.s32.totalorder %s946_s30, %s1643_s6 }
 0x396   : > { %p1214_p4 = scmp.lt.s32.totalorder %s1212_s5, %s1208_s7 }
 0x397   : > { %p1210_p9 = pnand %p1209_p5, %p1690_p3 }
 0x398   : > { %p1215_p6 = por %p1214_p4, %p1213_p1 }
 0x399   : > { %p1211_p12 = pneg %p1210_p9 }
 0x39b   : > { %p1216_p8 = pnand %p1215_p6, %p1211_p12 }
 0x39d   : > { %1219 = shalt.err (!%p1216_p8)
}
 0x39e   : > { %1058 = dma.vmem_to_hbm [thread:$0]  (%p1690_p3), %s949_s11, 128, %s946_s30, %s934_s26  }
 0x39f PF: > { %s960_s10 = sand.u32 1, %s1250_s21   ;;  %p1691_p11 = scmp.ne.s32.totalorder %s1664_s28, 0 }
 0x3a0   : > { %p1692_p7 = scmp.ge.s32.totalorder %s1262_s24, 2  ;;  %s961_s27 = scalar_lea.sflag [#allocation6], %s960_s10 }
 0x3a2   : > { %p1069_p10 = pnand %p1692_p7, %p1691_p11 }
 0x3a4   : > { %p1070_p2 = pneg %p1069_p10 }
 0x3a6   : > { %1245 = dma.done.wait (%p1070_p2), %s961_s27, 128  }
 0x3a7   : > { %1247 = vsyncadd (%p1070_p2), %s961_s27, 4294967168  ;;  %p20_p13 = scmp.ge.s32.totalorder %s1368_s9, 4   ;;  %s1693_s21 = smov %s1254_s22 }
 0x3a8   : > { %s1694_s22 = smov %s1258_s23  ;;  %s1695_s23 = smov %s1385_s17 }
 0x3a9   : > { %s1696_s24 = smov %s1368_s9  ;;  %22 = sbr.rel (!%p20_p13) target bundleno = 8 (0x8), region = 93 }
 0x3ae   :  { %966 = vsyncpa [#allocation5], 1 }
 0x3af   :  { %968 = vsyncpa [#allocation5 + $0x1], 1 }
 0x3b0   :  { %969 = vsyncpa [#allocation8], 1 }
 0x3b1   :  { %970 = vsyncpa [#allocation6], 1 }
 0x3b2   :  { %972 = vsyncpa [#allocation6 + $0x1], 1 }

</bundles_post_ra>
